<compile_context>
chip_gen: v7x
topology: tpu7x:2x2x1
jax: 0.10.0
libtpu: 0.0.40
codegen_flags: <defaults>
</compile_context>

<pallas_src>
import jax
import jax.numpy as jnp
import numpy as np
from jax import lax
from jax.experimental import pallas as pl
from jax.experimental.pallas import tpu as pltpu


# ---------------------------------------------------------------------------
# Kernel: fused (conv-as-matmul) + folded-BN bias epilogue.
# ---------------------------------------------------------------------------
def _make_kernel(mb):
    def kernel(w_ref, c_ref, x_ref, o_ref):
        # w_ref: (Cout_p, CK)     BN-folded conv weight (resident across grid)
        # c_ref: (Cout_p, 1)      fused conv-bias + BN shift
        # x_ref: (mb, CK, tn)     native-layout input tile (lanes = spatial N)
        # o_ref: (mb, Cout_p, tn) native-layout output tile
        w = w_ref[...]
        c = c_ref[...]
        for i in range(mb):  # static unroll over the samples in this block
            acc = jnp.dot(w, x_ref[i], preferred_element_type=jnp.float32)
            o_ref[i] = acc + c
    return kernel


# ---------------------------------------------------------------------------
# Wrapper.
# ---------------------------------------------------------------------------
def _round_up(x, m):
    return ((x + m - 1) // m) * m


def _largest_divisor_le(n, cap):
    for d in range(min(n, cap), 0, -1):
        if n % d == 0:
            return d
    return 1


def ms_downsampling_forward(x, params, *, kernel_size=1, stride=1, padding=0):
    """x: (T, B, C_in, N_in) float32. Returns (T, B, C_out, N_out) float32."""
    T, B, Cin, Nin = x.shape
    W = params["w"]                      # (C_out, C_in, K)
    b = params["b"].reshape(-1, 1)       # (C_out, 1) conv bias
    bn_s = params["bn_s"].reshape(-1, 1)  # (C_out, 1) folded BN scale
    bn_b = params["bn_b"].reshape(-1, 1)  # (C_out, 1) folded BN shift
    Cout, _, K = W.shape
    assert K == kernel_size

    Nout = (Nin + 2 * padding - K) // stride + 1
    M = T * B
    CK = Cin * K

    # ---- fold BatchNorm (eval mode) into the conv weights / bias ----------
    w_fold = W.reshape(Cout, CK) * bn_s                 # (Cout, CK)
    c_fold = b * bn_s + bn_b                            # (Cout, 1)

    # ---- build the kernel input in native (M, CK, Nout) layout ------------
    xm = x.reshape(M, Cin, Nin)
    if K == 1 and stride == 1 and padding == 0:
        x_col = xm                                      # pure reshape, Nout == Nin
    else:
        xp = jnp.pad(xm, ((0, 0), (0, 0), (padding, padding))) if padding else xm
        stop = (Nout - 1) * stride + 1
        cols = [xp[:, :, k:k + stop:stride] for k in range(K)]   # K x (M, Cin, Nout)
        x_col = jnp.stack(cols, axis=2).reshape(M, CK, Nout)     # no transpose
        # TODO(synk): K-fold input copy; in-kernel strided tap reads would avoid it.

    # ---- tiling / padding (lane tile first, then pad N up to it) ----------
    Cout_p = _round_up(Cout, 8)
    tn = min(2048, _round_up(Nout, 128))
    budget = 8 * 1024 * 1024  # double-buffered per-step VMEM budget (v7x-safe)
    while tn > 128 and 2 * (Cout_p + CK) * tn * 4 > budget:
        tn //= 2
    Nout_p = _round_up(Nout, tn)
    n_tiles = Nout_p // tn

    mb_cap = min(8, max(1, budget // (2 * (Cout_p + CK) * tn * 4)))
    if n_tiles == 1 and M > 1:
        mb_cap = min(mb_cap, max(1, M // 2))   # keep >=2 grid steps (megacore)
    mb = _largest_divisor_le(M, mb_cap)

    w_p = jnp.pad(w_fold, ((0, Cout_p - Cout), (0, 0)))
    c_p = jnp.pad(c_fold, ((0, Cout_p - Cout), (0, 0)))
    x_p = jnp.pad(x_col, ((0, 0), (0, 0), (0, Nout_p - Nout)))

    grid = (M // mb, n_tiles)
    out = pl.pallas_call(
        _make_kernel(mb),
        out_shape=jax.ShapeDtypeStruct((M, Cout_p, Nout_p), jnp.float32),
        grid=grid,
        in_specs=[
            pl.BlockSpec((Cout_p, CK), lambda m, n: (0, 0)),   # weight: resident
            pl.BlockSpec((Cout_p, 1), lambda m, n: (0, 0)),    # fused bias: resident
            pl.BlockSpec((mb, CK, tn), lambda m, n: (m, 0, n)),  # x: read exactly once
        ],
        out_specs=pl.BlockSpec((mb, Cout_p, tn), lambda m, n: (m, 0, n)),
        compiler_params=pltpu.CompilerParams(
            dimension_semantics=("parallel", "parallel")),
        cost_estimate=pl.CostEstimate(
            flops=2 * M * Cout * CK * Nout,
            transcendentals=0,
            bytes_accessed=4 * (M * CK * Nout + Cout * CK + M * Cout * Nout)),
    )(w_p, c_p, x_p)

    out = out[:, :Cout, :Nout].reshape(T, B, Cout, Nout)   # no transpose needed
    return out


# ---------------------------------------------------------------------------
# Deterministic parameters (eval-mode BN folded into scale/shift).
# ---------------------------------------------------------------------------
def init_params(key, in_channels, embed_dims, kernel_size, eps=1e-5):
    k1, k2, k3, k4, k5, k6 = jax.random.split(key, 6)
    fan_in = in_channels * kernel_size
    w = (jax.random.normal(k1, (embed_dims, in_channels, kernel_size))
         / np.sqrt(fan_in)).astype(jnp.float32)
    b = (0.1 * jax.random.normal(k2, (embed_dims,))).astype(jnp.float32)
    gamma = (1.0 + 0.1 * jax.random.normal(k3, (embed_dims,))).astype(jnp.float32)
    beta = (0.1 * jax.random.normal(k4, (embed_dims,))).astype(jnp.float32)
    mean = (0.1 * jax.random.normal(k5, (embed_dims,))).astype(jnp.float32)
    var = (0.5 + jax.random.uniform(k6, (embed_dims,))).astype(jnp.float32)
    scale = gamma / jnp.sqrt(var + eps)
    shift = beta - mean * scale
    return {"w": w, "b": b, "bn_s": scale.astype(jnp.float32),
            "bn_b": shift.astype(jnp.float32)}


# ---------------------------------------------------------------------------
# Pure-JAX reference (same semantics) for a correctness check.
# ---------------------------------------------------------------------------
def reference_forward(x, params, kernel_size, stride, padding):
    T, B, Cin, Nin = x.shape
    xf = x.reshape(T * B, Cin, Nin)
    out = lax.conv_general_dilated(
        xf, params["w"],
        window_strides=(stride,),
        padding=[(padding, padding)],
        dimension_numbers=("NCH", "OIH", "NCH"),
        precision=lax.Precision.HIGHEST,
    )
    out = out + params["b"].reshape(1, -1, 1)
    out = out * params["bn_s"].reshape(1, -1, 1) + params["bn_b"].reshape(1, -1, 1)
    Nout = out.shape[-1]
    return out.reshape(T, B, -1, Nout)


if __name__ == "__main__":
    key = jax.random.PRNGKey(0)
    kx, kp = jax.random.split(key)

    # Small shapes consistent with the module: (T, B, C_in, N_in).
    T, B, Cin, Nin, Cout = 4, 2, 2, 128, 32
    x = jax.random.normal(kx, (T, B, Cin, Nin), dtype=jnp.float32)

    # Config 1: module defaults (kernel_size=1, stride=1, padding=0).
    params1 = init_params(kp, Cin, Cout, 1)
    out1 = jax.block_until_ready(
        ms_downsampling_forward(x, params1, kernel_size=1, stride=1, padding=0))
    assert out1.shape == (T, B, Cout, Nin)
    ref1 = jax.block_until_ready(reference_forward(x, params1, 1, 1, 0))
    np.testing.assert_allclose(np.asarray(out1), np.asarray(ref1),
                               rtol=1e-3, atol=1e-3)

    # Config 2: strided 3-tap conv (actual down-sampling use of the module).
    K2, S2, P2 = 3, 2, 1
    params2 = init_params(jax.random.fold_in(kp, 1), Cin, Cout, K2)
    out2 = jax.block_until_ready(
        ms_downsampling_forward(x, params2, kernel_size=K2, stride=S2, padding=P2))
    Nout2 = (Nin + 2 * P2 - K2) // S2 + 1
    assert out2.shape == (T, B, Cout, Nout2)
    ref2 = jax.block_until_ready(reference_forward(x, params2, K2, S2, P2))
    np.testing.assert_allclose(np.asarray(out2), np.asarray(ref2),
                               rtol=1e-3, atol=1e-3)

    print("KERNEL_OK")
</pallas_src>

<mosaic_0001>
module attributes {stable_mosaic.version = 11 : i64} {
  func.func @kernel(%arg0: i32, %arg1: i32, %arg2: memref<32x2xf32, #tpu.memory_space<vmem>>, %arg3: memref<32x1xf32, #tpu.memory_space<vmem>>, %arg4: memref<4x2x128xf32, #tpu.memory_space<vmem>>, %arg5: memref<4x32x128xf32, #tpu.memory_space<vmem>>) attributes {dimension_semantics = [#tpu.dimension_semantics<parallel>, #tpu.dimension_semantics<parallel>], iteration_bounds = array<i64: 2, 1>, scalar_prefetch = 0 : i64, scratch_operands = 0 : i64, tpu.core_type = #tpu.core_type<tc>, window_params = [{pipeline_mode = #tpu.pipeline_mode<synchronous>, transform_indices = @transform_0, window_bounds = array<i64: 32, 2>}, {pipeline_mode = #tpu.pipeline_mode<synchronous>, transform_indices = @transform_1, window_bounds = array<i64: 32, 1>}, {transform_indices = @transform_2, window_bounds = array<i64: 4, 2, 128>}, {transform_indices = @transform_3, window_bounds = array<i64: 4, 32, 128>}]} {
    %c0 = arith.constant 0 : index
    %c0_0 = arith.constant 0 : index
    %0 = vector.load %arg2[%c0, %c0_0] : memref<32x2xf32, #tpu.memory_space<vmem>>, vector<32x2xf32>
    %c0_1 = arith.constant 0 : index
    %c0_2 = arith.constant 0 : index
    %1 = vector.load %arg3[%c0_1, %c0_2] : memref<32x1xf32, #tpu.memory_space<vmem>>, vector<32x1xf32>
    %c0_3 = arith.constant 0 : index
    %c0_4 = arith.constant 0 : index
    %c0_5 = arith.constant 0 : index
    %2 = vector.load %arg4[%c0_3, %c0_4, %c0_5] : memref<4x2x128xf32, #tpu.memory_space<vmem>>, vector<1x2x128xf32>
    %3 = vector.shape_cast %2 : vector<1x2x128xf32> to vector<2x128xf32>
    %cst = arith.constant dense<0.000000e+00> : vector<32x128xf32>
    %4 = tpu.matmul %0, %3, %cst {dimension_numbers = #tpu.dot_dimension_numbers<[1], [0], [0], [1], [0, 0, 1, 1], [], []>} : vector<32x2xf32>, vector<2x128xf32>, vector<32x128xf32> -> vector<32x128xf32>
    %5 = vector.broadcast %1 : vector<32x1xf32> to vector<32x128xf32>
    %6 = arith.addf %4, %5 : vector<32x128xf32>
    %c0_6 = arith.constant 0 : index
    %c0_7 = arith.constant 0 : index
    %c0_8 = arith.constant 0 : index
    %7 = vector.load %arg5[%c0_6, %c0_7, %c0_8] : memref<4x32x128xf32, #tpu.memory_space<vmem>>, vector<1x32x128xf32>
    %8 = vector.shape_cast %7 : vector<1x32x128xf32> to vector<32x128xf32>
    %9 = vector.shape_cast %6 : vector<32x128xf32> to vector<1x32x128xf32>
    tpu.vector_store %arg5[%c0_6, %c0_7, %c0_8], %9 {strides = array<i32>} : memref<4x32x128xf32, #tpu.memory_space<vmem>>, vector<1x32x128xf32>,
    %c1 = arith.constant 1 : index
    %c0_9 = arith.constant 0 : index
    %c0_10 = arith.constant 0 : index
    %10 = vector.load %arg4[%c1, %c0_9, %c0_10] : memref<4x2x128xf32, #tpu.memory_space<vmem>>, vector<1x2x128xf32>
    %11 = vector.shape_cast %10 : vector<1x2x128xf32> to vector<2x128xf32>
    %cst_11 = arith.constant dense<0.000000e+00> : vector<32x128xf32>
    %12 = tpu.matmul %0, %11, %cst_11 {dimension_numbers = #tpu.dot_dimension_numbers<[1], [0], [0], [1], [0, 0, 1, 1], [], []>} : vector<32x2xf32>, vector<2x128xf32>, vector<32x128xf32> -> vector<32x128xf32>
    %13 = vector.broadcast %1 : vector<32x1xf32> to vector<32x128xf32>
    %14 = arith.addf %12, %13 : vector<32x128xf32>
    %c1_12 = arith.constant 1 : index
    %c0_13 = arith.constant 0 : index
    %c0_14 = arith.constant 0 : index
    %15 = vector.load %arg5[%c1_12, %c0_13, %c0_14] : memref<4x32x128xf32, #tpu.memory_space<vmem>>, vector<1x32x128xf32>
    %16 = vector.shape_cast %15 : vector<1x32x128xf32> to vector<32x128xf32>
    %17 = vector.shape_cast %14 : vector<32x128xf32> to vector<1x32x128xf32>
    tpu.vector_store %arg5[%c1_12, %c0_13, %c0_14], %17 {strides = array<i32>} : memref<4x32x128xf32, #tpu.memory_space<vmem>>, vector<1x32x128xf32>,
    %c2 = arith.constant 2 : index
    %c0_15 = arith.constant 0 : index
    %c0_16 = arith.constant 0 : index
    %18 = vector.load %arg4[%c2, %c0_15, %c0_16] : memref<4x2x128xf32, #tpu.memory_space<vmem>>, vector<1x2x128xf32>
    %19 = vector.shape_cast %18 : vector<1x2x128xf32> to vector<2x128xf32>
    %cst_17 = arith.constant dense<0.000000e+00> : vector<32x128xf32>
    %20 = tpu.matmul %0, %19, %cst_17 {dimension_numbers = #tpu.dot_dimension_numbers<[1], [0], [0], [1], [0, 0, 1, 1], [], []>} : vector<32x2xf32>, vector<2x128xf32>, vector<32x128xf32> -> vector<32x128xf32>
    %21 = vector.broadcast %1 : vector<32x1xf32> to vector<32x128xf32>
    %22 = arith.addf %20, %21 : vector<32x128xf32>
    %c2_18 = arith.constant 2 : index
    %c0_19 = arith.constant 0 : index
    %c0_20 = arith.constant 0 : index
    %23 = vector.load %arg5[%c2_18, %c0_19, %c0_20] : memref<4x32x128xf32, #tpu.memory_space<vmem>>, vector<1x32x128xf32>
    %24 = vector.shape_cast %23 : vector<1x32x128xf32> to vector<32x128xf32>
    %25 = vector.shape_cast %22 : vector<32x128xf32> to vector<1x32x128xf32>
    tpu.vector_store %arg5[%c2_18, %c0_19, %c0_20], %25 {strides = array<i32>} : memref<4x32x128xf32, #tpu.memory_space<vmem>>, vector<1x32x128xf32>,
    %c3 = arith.constant 3 : index
    %c0_21 = arith.constant 0 : index
    %c0_22 = arith.constant 0 : index
    %26 = vector.load %arg4[%c3, %c0_21, %c0_22] : memref<4x2x128xf32, #tpu.memory_space<vmem>>, vector<1x2x128xf32>
    %27 = vector.shape_cast %26 : vector<1x2x128xf32> to vector<2x128xf32>
    %cst_23 = arith.constant dense<0.000000e+00> : vector<32x128xf32>
    %28 = tpu.matmul %0, %27, %cst_23 {dimension_numbers = #tpu.dot_dimension_numbers<[1], [0], [0], [1], [0, 0, 1, 1], [], []>} : vector<32x2xf32>, vector<2x128xf32>, vector<32x128xf32> -> vector<32x128xf32>
    %29 = vector.broadcast %1 : vector<32x1xf32> to vector<32x128xf32>
    %30 = arith.addf %28, %29 : vector<32x128xf32>
    %c3_24 = arith.constant 3 : index
    %c0_25 = arith.constant 0 : index
    %c0_26 = arith.constant 0 : index
    %31 = vector.load %arg5[%c3_24, %c0_25, %c0_26] : memref<4x32x128xf32, #tpu.memory_space<vmem>>, vector<1x32x128xf32>
    %32 = vector.shape_cast %31 : vector<1x32x128xf32> to vector<32x128xf32>
    %33 = vector.shape_cast %30 : vector<32x128xf32> to vector<1x32x128xf32>
    tpu.vector_store %arg5[%c3_24, %c0_25, %c0_26], %33 {strides = array<i32>} : memref<4x32x128xf32, #tpu.memory_space<vmem>>, vector<1x32x128xf32>,
    return
  }
  func.func @transform_0(%arg0: i32, %arg1: i32) -> (i32, i32) {
    %c0_i32 = arith.constant 0 : i32
    %c0_i32_0 = arith.constant 0 : i32
    %c0_i32_1 = arith.constant 0 : i32
    return %c0_i32, %c0_i32_0 : i32, i32
  }
  func.func @transform_1(%arg0: i32, %arg1: i32) -> (i32, i32) {
    %c0_i32 = arith.constant 0 : i32
    %c0_i32_0 = arith.constant 0 : i32
    %c0_i32_1 = arith.constant 0 : i32
    return %c0_i32, %c0_i32_0 : i32, i32
  }
  func.func @transform_2(%arg0: i32, %arg1: i32) -> (i32, i32, i32) {
    %c0_i32 = arith.constant 0 : i32
    %c0_i32_0 = arith.constant 0 : i32
    return %arg0, %c0_i32, %arg1 : i32, i32, i32
  }
  func.func @transform_3(%arg0: i32, %arg1: i32) -> (i32, i32, i32) {
    %c0_i32 = arith.constant 0 : i32
    %c0_i32_0 = arith.constant 0 : i32
    return %arg0, %c0_i32, %arg1 : i32, i32, i32
  }
}

</mosaic_0001>

<bundles_post_ra>
// kernel: tpu_custom_call.1
= control target key start
LH: loop header
LB: loop body
LE: loop exit
PB: predicated region body
PF: predicated region fallthrough
CT: control target
= control target key end

     0   :  { %8 = vsyncpa [#allocation3], 0  ;;  %s1160_s0 = inlined_call_operand.vmem [shape: f32[32,2], index: 0, kind: input, shape index: {}]   ;;  %s1161_s1 = inlined_call_operand.vmem [shape: f32[32,1], index: 1, kind: input, shape index: {}]   ;;  %s1162_s2 = inlined_call_operand.vmem [shape: f32[8,2,128], index: 2, kind: input, shape index: {}]   ;;  %s1163_s3 = inlined_call_operand.hbm [shape: f32[8,32,128], index: 3, kind: output, shape index: {}]  }
   0x1   :  { %10 = vsyncpa [#allocation3 + $0x1], 0  ;;  %s975_s12 = smov 0   ;;  %s977_s13 = smov 0  }
   0x2   :  { %s979_s14 = smov 0   ;;  %s981_s15 = smov 0  }
   0x3   :  { %s983_s16 = smov 0   ;;  %s985_s17 = smov 0  }
   0x4 LB: > { %s708_s18 = sadd.s32 4294967295, %s949_s17   ;;  %s709_s19 = sadd.s32 4294967294, %s949_s17   ;;  %s949_s17 = sphi %s985_s17, %s16_s17   ;;  %s945_s16 = sphi %s983_s16, %s1170_s16   ;;  %s941_s15 = sphi %s981_s15, %s1169_s15   ;;  %s937_s14 = sphi %s979_s14, %s1168_s14   ;;  %s933_s13 = sphi %s977_s13, %s1167_s13   ;;  %s929_s12 = sphi %s975_s12, %s1166_s12  }
   0x5   : > { %s28_s20 = sadd.s32 1, %s945_s16  ;;  %s107_s21 = sadd.s32 1, %s937_s14 }
   0x6   : > { %p30_p0 = scmp.ge.s32.totalorder %s28_s20, 2  ;;  %p117_p1 = scmp.ne.s32.totalorder %s937_s14, %s933_s13 }
   0x7   : > { %p118_p2 = scmp.eq.s32.totalorder %s708_s18, 1  ;;  %p123_p3 = scmp.ne.s32.totalorder %s933_s13, %s929_s12 }
   0x8   : > { %s1172_s20 = smov (%p30_p0, %s28_s20), 0  ;;  %p124_p5 = scmp.eq.s32.totalorder %s709_s19, 1 }
   0x9   : > { %p1015_p4 = por %p118_p2, %p117_p1  ;;  %s102_s23 = ssub.s32 %s945_s16, %s1172_s20 }
   0xa   : > { %p712_p6 = scmp.ge.s32.totalorder %s949_s17, 1  ;;  %p105_p7 = scmp.eq.s32.totalorder %s102_s23, 0 }
   0xb   : > { %p1022_p8 = por %p124_p5, %p123_p3  ;;  %p160_p9 = scmp.lt.s32.totalorder %s949_s17, 3 }
   0xc   : > { %s1028_s25 = scalar_select %p105_p7, %s937_s14, %s107_s21  }
   0xd   : > { %p161_p10 = pnand %p712_p6, %p160_p9 }
   0xe   : > { %s714_s26 = sshll.u32 (!%p161_p10), %s941_s15, 2  ;;  %v197_v0 = vld [vmem:[%s1160_s0] sm:$0xff] (!%p161_p10)  ;;  %vm226_vm0 = vcmask (!%p161_p10), 15360   ;;  %v203_v2 = vld [vmem:[%s1161_s1 + $0x10] sm:$0xff] (!%p161_p10)  ;;  %v951_v3 = vmov (!%p161_p10), 0   ;;  %v202_v4 = vld [vmem:[%s1161_s1 + $0x8] sm:$0xff] (!%p161_p10) }
   0xf   : > { %164 = sbr.rel (%p161_p10) target bundleno = 270 (0x10e), region = 32  ;;  %p188_p11 = scmp.lt.s32.totalorder (!%p161_p10), %s714_s26, 7  ;;  %781 = vmatprep.mubr.msk.f32.mxu0 (!%p161_p10), %vm226_vm0, %v197_v0  ;;  %789 = vmatprep.mubr.msk.f32.mxu1 (!%p161_p10), %vm226_vm0, %v197_v0  ;;  %v201_v1 = vld [vmem:[%s1161_s1] sm:$0xff] (!%p161_p10)  ;;  %v204_v5 = vld [vmem:[%s1161_s1 + $0x18] sm:$0xff] (!%p161_p10)  ;;  %vm239_vm1 = vcmask (!%p161_p10), 1041408   ;;  %v198_v8 = vld [vmem:[%s1160_s0 + $0x8] sm:$0xff] (!%p161_p10) }
  0x10   : > { %869 = vset.pattern.permute.xlu0 (!%p161_p10), %v951_v3  ;;  %870 = vset.pattern.permute.xlu1 (!%p161_p10), %v951_v3  ;;  %v199_v11 = vld [vmem:[%s1160_s0 + $0x10] sm:$0xff] (!%p161_p10)  ;;  %v200_v12 = vld [vmem:[%s1160_s0 + $0x18] sm:$0xff] (!%p161_p10)  ;;  %s184_s30 = sand.u32 (!%p161_p10), 1, %s933_s13   ;;  %s758_s6 = sshll.u32 (!%p161_p10), %s941_s15, 11 }
  0x11   : > { %208 = vperm.xlu0 (!%p161_p10), %869, %v201_v1   ;;  %218 = vperm.xlu1 (!%p161_p10), %870, %v203_v2   ;;  %s713_s4 = sshll.u32 (!%p161_p10), %s184_s30, 7  ;;  %s1104_s15 = scalar_lea.hbm (!%p161_p10), %s1163_s3, %s758_s6 }
  0x12   : > { %s1085_s5 = scalar_lea.vmem (!%p161_p10), [#allocation2], %s713_s4  ;;  %s952_s18 = smov (!%p161_p10), [#allocation2]  }
  0x13   : > { %s633_s7 = sshll.u32 (!%p161_p10), %s1085_s5, 4  ;;  %s1106_s7 = int_to_ptr.vmem [resolvable:$true] %s633_s7 }
  0x14   : > { %s871_s11 = scalar_lea.vmem (!%p161_p10), %s1106_s7, 2048 }
  0x15   : > { %213 = vperm.xlu0 (!%p161_p10), %869, %v202_v4   ;;  %223 = vperm.xlu1 (!%p161_p10), %870, %v204_v5   ;;  %p872_p12 = scmp.ne.s32.totalorder (!%p161_p10), %s1106_s7, %s871_s11 }
  0x16   : > { %s1174_s26 = smov (!%p188_p11, %s714_s26), 7 }
  0x17   : > { %s715_s10 = sshll.u32 %s1174_s26, 1  ;;  %p873_p13 = pnand %p872_p12, %p1015_p4 }
  0x18   : > { %s194_s19 = scalar_lea.vmem %s1162_s2, %s715_s10  ;;  %s1114_s10 = scalar_lea.sflag [#allocation3], %s184_s30 }
  0x19   : > { %v205_v6 = vld [vmem:[%s194_s19] sm:$0x3]  ;;  %v721_v7 = vld [vmem:[%s194_s19 + $0x2] sm:$0x3]  ;;  %v731_v9 = vld [vmem:[%s194_s19 + $0x4] sm:$0x3]  ;;  %p874_p0 = pneg %p873_p13 }
  0x1a   : > { %779 = vmatprep.subr.msk.mxu0 %vm239_vm1, %v205_v6  ;;  %787 = vmatprep.subr.msk.mxu1 %vm239_vm1, %v721_v7  ;;  %v741_v10 = vld [vmem:[%s194_s19 + $0x6] sm:$0x3]  ;;  %s875_s19 = sshll.u32 %s952_s18, 4  ;;  %s876_s19 = int_to_ptr.vmem [resolvable:$false] %s875_s19 }
  0x1b   : > { %780 = vmatpush3.msk.msra.mxu0 %vm239_vm1, %v205_v6  ;;  %788 = vmatpush3.msk.msra.mxu1 %vm239_vm1, %v721_v7  ;;  %s877_s21 = scalar_lea.vmem %s876_s19, 4096  ;;  %p878_p1 = scmp.lt.s32.totalorder %s1106_s7, %s876_s19 }
  0x1c   : > { %782 = vmatmul.mubr.msk.f32.vlgmr.msra.gmra.mrb[0].mxu0 %vm226_vm0, %v198_v8  ;;  %790 = vmatmul.mubr.msk.f32.vlgmr.msra.gmra.mrb[0].mxu1 %vm226_vm0, %v198_v8  ;;  %p879_p2 = scmp.lt.s32.totalorder %s877_s21, %s871_s11 }
  0x1d   : > { %795 = vmatprep.subr.msk.mxu0 %vm239_vm1, %v731_v9  ;;  %803 = vmatprep.subr.msk.mxu1 %vm239_vm1, %v741_v10 }
  0x1e   : > { %796 = vmatpush3.msk.msra.mxu0 %vm239_vm1, %v731_v9  ;;  %804 = vmatpush3.msk.msra.mxu1 %vm239_vm1, %v741_v10  ;;  %p880_p3 = por %p879_p2, %p878_p1 }
  0x1f   : > { %784 = vmatprep.mubr.msk.f32.mxu0 %vm226_vm0, %v199_v11  ;;  %792 = vmatprep.mubr.msk.f32.mxu1 %vm226_vm0, %v199_v11 }
  0x20   : > { %785 = vmatmul.mubr.msk.f32.gmra.mrb[2].mxu0 %vm226_vm0, %v200_v12  ;;  %793 = vmatmul.mubr.msk.f32.gmra.mrb[2].mxu1 %vm226_vm0, %v200_v12  ;;  %p881_p5 = pnand %p880_p3, %p874_p0 }
  0x21   : > { %797 = vmatprep.mubr.msk.f32.mxu0 %vm226_vm0, %v197_v0  ;;  %805 = vmatprep.mubr.msk.f32.mxu1 %vm226_vm0, %v197_v0 }
  0x24   : > { %798 = vmatmul.mubr.msk.f32.vlgmr.msra.gmra.mrb[4].mxu0 %vm226_vm0, %v198_v8  ;;  %806 = vmatmul.mubr.msk.f32.vlgmr.msra.gmra.mrb[4].mxu1 %vm226_vm0, %v198_v8 }
  0x25   : > { %800 = vmatprep.mubr.msk.f32.mxu0 %vm226_vm0, %v199_v11  ;;  %808 = vmatprep.mubr.msk.f32.mxu1 %vm226_vm0, %v199_v11 }
  0x28   : > { %801 = vmatmul.mubr.msk.f32.gmra.mrb[6].mxu0 %vm226_vm0, %v200_v12  ;;  %809 = vmatmul.mubr.msk.f32.gmra.mrb[6].mxu1 %vm226_vm0, %v200_v12 }
  0x90   : > { %v209_v13 = vpop.permute.xlu0 %208  ;;  %v219_v14 = vpop.permute.xlu1 %218 }
  0x94   : > { %v214_v15 = vpop.permute.xlu0 %213  ;;  %v224_v24 = vpop.permute.xlu1 %223 }
  0xef   : > { %v783_v16 = vpop.f32.mrb[0].mxu0  ;;  %v791_v17 = vpop.f32.mrb[0].mxu1 }
  0xf0   : > { %v315_v18 = vadd.f32 %v783_v16, %v214_v15  ;;  %v409_v19 = vadd.f32 %v791_v17, %v214_v15  ;;  %v309_v20 = vpop.f32.mrb[1].mxu0  ;;  %v403_v21 = vpop.f32.mrb[1].mxu1 }
  0xf1   : > { %v310_v22 = vadd.f32 %v309_v20, %v209_v13  ;;  %v404_v23 = vadd.f32 %v403_v21, %v209_v13 }
  0xf2   : > { %329 = vst [vmem:[%s1085_s5 + $0x8] sm:$0xff] %v315_v18  ;;  %728 = vst [vmem:[%s1085_s5 + $0x28] sm:$0xff] %v409_v19 }
  0xf3   : > { %328 = vst [vmem:[%s1085_s5] sm:$0xff] %v310_v22  ;;  %727 = vst [vmem:[%s1085_s5 + $0x20] sm:$0xff] %v404_v23  ;;  %v786_v25 = vpop.f32.mrb[2].mxu0  ;;  %v794_v26 = vpop.f32.mrb[2].mxu1 }
  0xf4   : > { %v325_v27 = vadd.f32 %v786_v25, %v224_v24  ;;  %v419_v28 = vadd.f32 %v794_v26, %v224_v24  ;;  %v319_v29 = vpop.f32.mrb[3].mxu0  ;;  %v413_v30 = vpop.f32.mrb[3].mxu1 }
  0xf5   : > { %v320_v31 = vadd.f32 %v319_v29, %v219_v14  ;;  %v414_v32 = vadd.f32 %v413_v30, %v219_v14 }
  0xf6   : > { %331 = vst [vmem:[%s1085_s5 + $0x18] sm:$0xff] %v325_v27  ;;  %730 = vst [vmem:[%s1085_s5 + $0x38] sm:$0xff] %v419_v28 }
  0xf7   : > { %330 = vst [vmem:[%s1085_s5 + $0x10] sm:$0xff] %v320_v31  ;;  %729 = vst [vmem:[%s1085_s5 + $0x30] sm:$0xff] %v414_v32  ;;  %v799_v33 = vpop.f32.mrb[4].mxu0  ;;  %v807_v34 = vpop.f32.mrb[4].mxu1 }
  0xf8   : > { %v504_v35 = vadd.f32 %v799_v33, %v214_v15  ;;  %v599_v36 = vadd.f32 %v807_v34, %v214_v15  ;;  %v498_v37 = vpop.f32.mrb[5].mxu0  ;;  %v593_v38 = vpop.f32.mrb[5].mxu1 }
  0xf9   : > { %v499_v39 = vadd.f32 %v498_v37, %v209_v13  ;;  %v594_v40 = vadd.f32 %v593_v38, %v209_v13 }
  0xfa   : > { %738 = vst [vmem:[%s1085_s5 + $0x48] sm:$0xff] %v504_v35  ;;  %748 = vst [vmem:[%s1085_s5 + $0x68] sm:$0xff] %v599_v36 }
  0xfb   : > { %737 = vst [vmem:[%s1085_s5 + $0x40] sm:$0xff] %v499_v39  ;;  %747 = vst [vmem:[%s1085_s5 + $0x60] sm:$0xff] %v594_v40  ;;  %v802_v41 = vpop.f32.mrb[6].mxu0  ;;  %v810_v42 = vpop.f32.mrb[6].mxu1 }
  0xfc   : > { %v514_v43 = vadd.f32 %v802_v41, %v224_v24  ;;  %v609_v44 = vadd.f32 %v810_v42, %v224_v24  ;;  %v508_v45 = vpop.f32.mrb[7].mxu0  ;;  %v603_v46 = vpop.f32.mrb[7].mxu1 }
  0xfd   : > { %v509_v47 = vadd.f32 %v508_v45, %v219_v14  ;;  %v604_v48 = vadd.f32 %v603_v46, %v219_v14 }
  0xfe   : > { %740 = vst [vmem:[%s1085_s5 + $0x58] sm:$0xff] %v514_v43  ;;  %750 = vst [vmem:[%s1085_s5 + $0x78] sm:$0xff] %v609_v44 }
  0xff   : > { %739 = vst [vmem:[%s1085_s5 + $0x50] sm:$0xff] %v509_v47  ;;  %749 = vst [vmem:[%s1085_s5 + $0x70] sm:$0xff] %v604_v48 }
 0x100   : > { %884 = shalt.err (!%p881_p5)
}
 0x101   : > { %s885_s23 = scalar_lea.hbm %s1104_s15, 2048  ;;  %s889_s28 = scalar_lea.hbm %s1163_s3, 4096 }
 0x102   : > { %p886_p6 = scmp.ne.s32.totalorder %s1104_s15, %s885_s23  ;;  %p890_p10 = scmp.lt.u32.totalorder %s1104_s15, %s1163_s3 }
 0x103   : > { %p891_p11 = scmp.lt.u32.totalorder %s889_s28, %s885_s23  ;;  %p893_p13 = scmp.lt.u32.totalorder %s885_s23, %s1104_s15 }
 0x104   : > { %p887_p7 = pnand %p886_p6, %p1015_p4 }
 0x105   : > { %p892_p12 = por %p891_p11, %p890_p10 }
 0x106   : > { %p888_p9 = pneg %p887_p7 }
 0x107   : > { %p894_p0 = por %p893_p13, %p892_p12 }
 0x109   : > { %p895_p1 = pnand %p894_p0, %p888_p9 }
 0x10b   : > { %898 = shalt.err (!%p895_p1)
}
 0x10c   : > { %s953_s4 = smov 128   ;;  %s954_s5 = smov 8  }
 0x10d   : > { %811 = dma.vmem_to_hbm [thread:$0]  (%p1015_p4), %s1106_s7, 2048, %s1104_s15, %s1114_s10, %s953_s4, %s953_s4, %s954_s5  }
 0x10e PF: > { %p817_p2 = scmp.ge.s32.totalorder %s949_s17, 2  ;;  %s648_s6 = sand.u32 1, %s929_s12  }
 0x10f   : > { %s649_s8 = scalar_lea.sflag [#allocation3], %s648_s6 }
 0x110   : > { %p814_p3 = pnand %p817_p2, %p1022_p8 }
 0x112   : > { %924 = dma.done.wait (!%p814_p3), %s649_s8, 2048  }
 0x113   : > { %926 = vsyncadd (!%p814_p3), %s649_s8, 4294965248  ;;  %s16_s17 = sadd.s32 1, %s949_s17   ;;  %s1166_s12 = smov %s933_s13 }
 0x114   : > { %p13_p5 = scmp.ge.s32.totalorder %s16_s17, 4   ;;  %s1167_s13 = smov %s937_s14 }
 0x115   : > { %s1168_s14 = smov %s1028_s25  ;;  %s1169_s15 = smov %s945_s16 }
 0x116   : > { %s1170_s16 = smov %s1172_s20  ;;  %15 = sbr.rel (!%p13_p5) target bundleno = 4 (0x4), region = 73 }
 0x11d   :  { %654 = vsyncpa [#allocation3], 1 }
 0x11e   :  { %656 = vsyncpa [#allocation3 + $0x1], 1 }

</bundles_post_ra>
